<compile_context>
chip_gen: v7x
topology: tpu7x:2x2x1
jax: 0.10.0
libtpu: 0.0.40
codegen_flags: <defaults>
</compile_context>

<pallas_src>
import jax
import jax.numpy as jnp
from jax.experimental import pallas as pl
from jax.experimental.pallas import tpu as pltpu


def _round_up(v, mult):
    return ((v + mult - 1) // mult) * mult


def _snn_kernel(x_ref, w1_ref, b1_ref, w2_ref, b2_ref, o_ref):
    # x_ref : (tb, n)        w1_ref: (n, m)
    # b1_ref: (1, m) f32     w2_ref: (1, m) f32     b2_ref: (1, 1) f32 in SMEM
    # o_ref : (tb, 1) f32    (one logit per sample in this batch tile)

    # hidden = tanh(x @ w1 + b1) : (tb, m), f32 accumulation on the MXU
    h = jnp.tanh(
        jnp.dot(x_ref[...], w1_ref[...], preferred_element_type=jnp.float32)
        + b1_ref[...]
    )

    # Second (m -> 1) layer as a per-row lane reduction: no sublane->lane
    # relayout of h and no degenerate N=1 MXU matmul.  m sits on lanes, batch
    # stays on sublanes, so this is a cheap (4-lane) reduce per row.
    logits = jnp.sum(h * w2_ref[...], axis=1, keepdims=True)

    o_ref[...] = logits + b2_ref[0, 0]


def second_neural_network_forward(x, w1, b1, w2, b2, *, block_rows=8192):
    """Batched equivalent of SecondNeuralNetwork.forward: one logit per sample.

    x : (B, n)   w1 : (n, m)   b1 : (m,) or (1, m)   w2 : (m, 1)   b2 : (1, 1)
    returns logits of shape (B, 1), float32.
    """
    B, n = x.shape
    m = w1.shape[1]

    # Stream x as-is (no extra HBM pass for a dtype convert); match w1 to it.
    x_in = x
    w1_in = jnp.asarray(w1, x.dtype)
    b1_f = jnp.asarray(b1, jnp.float32).reshape(1, m)
    w2_row = jnp.asarray(w2, jnp.float32).reshape(1, m)   # (m, 1) -> (1, m)
    b2_s = jnp.asarray(b2, jnp.float32).reshape(1, 1)

    # Batch tile selection:
    #  * B > block_rows: big fixed tiles (amortize ~0.35us/step overhead).
    #  * moderate B     : split into ~4 tiles so g >= 2 (v7x megacore +
    #                     double-buffered pipelining stay active).
    #  * tiny B         : single full-array tile.
    assert block_rows % 8 == 0, "batch tile must be a multiple of 8"
    if B > block_rows:
        tb = block_rows
    elif B >= 32:
        tb = min(block_rows, _round_up(pl.cdiv(B, 4), 8))
    else:
        tb = B
    g = pl.cdiv(B, tb)

    itemsize = jnp.dtype(x.dtype).itemsize
    cost = pl.CostEstimate(
        flops=2 * B * n * m + 4 * B * m,
        transcendentals=B * m,
        bytes_accessed=B * n * itemsize + B * 4 + (n * m + 2 * m + 1) * 4,
    )

    out = pl.pallas_call(
        _snn_kernel,
        out_shape=jax.ShapeDtypeStruct((B, 1), jnp.float32),
        grid=(g,),
        in_specs=[
            # x: one batch tile per grid step (double-buffered DMA).
            pl.BlockSpec((tb, n), lambda i: (i, 0)),
            # weights/biases: constant index_map -> fetched once, stay resident.
            pl.BlockSpec((n, m), lambda i: (0, 0)),
            pl.BlockSpec((1, m), lambda i: (0, 0)),
            pl.BlockSpec((1, m), lambda i: (0, 0)),
            # b2: scalar in SMEM (no padded VMEM tile).
            pl.BlockSpec(memory_space=pltpu.MemorySpace.SMEM),
        ],
        out_specs=pl.BlockSpec((tb, 1), lambda i: (i, 0)),
        compiler_params=pltpu.CompilerParams(
            dimension_semantics=("parallel",),
            vmem_limit_bytes=40 * 1024 * 1024,
        ),
        cost_estimate=cost,
    )(x_in, w1_in, b1_f, w2_row, b2_s)

    return out


def _reference(x, w1, b1, w2, b2):
    return jnp.tanh(x @ w1 + b1.reshape(1, -1)) @ w2 + b2.reshape(1, 1)


if __name__ == "__main__":
    # Module defaults: vector_size n=20, feature_size m=4.
    n, m = 20, 4

    key = jax.random.PRNGKey(0)
    kx, kx2, k1, k2, k3, k4 = jax.random.split(key, 6)

    w1 = jax.random.normal(k1, (n, m), dtype=jnp.float32) * 0.1
    b1 = jax.random.normal(k2, (1, m), dtype=jnp.float32) * 0.1
    w2 = jax.random.normal(k3, (m, 1), dtype=jnp.float32) * 0.1
    b2 = jax.random.normal(k4, (1, 1), dtype=jnp.float32) * 0.1

    # Case 1: tiny batch (single full-array tile), matches module defaults.
    B1 = 8
    x1 = jax.random.normal(kx, (B1, n), dtype=jnp.float32)
    out1 = jax.block_until_ready(second_neural_network_forward(x1, w1, b1, w2, b2))
    ref1 = _reference(x1, w1, b1, w2, b2)
    assert out1.shape == (B1, 1)
    assert jnp.allclose(out1, ref1, atol=1e-3, rtol=1e-3)

    # Case 2: multi-tile grid with a partial last tile (exercises pipelining,
    # megacore sharding of the batch axis, and masked tail writeback).
    B2 = 2500
    x2 = jax.random.normal(kx2, (B2, n), dtype=jnp.float32)
    out2 = jax.block_until_ready(
        second_neural_network_forward(x2, w1, b1, w2, b2, block_rows=1024)
    )
    ref2 = _reference(x2, w1, b1, w2, b2)
    assert out2.shape == (B2, 1)
    assert jnp.allclose(out2, ref2, atol=1e-3, rtol=1e-3)

    print("KERNEL_OK")
</pallas_src>

<mosaic_0001>
module attributes {stable_mosaic.version = 11 : i64} {
  func.func @_snn_kernel(%arg0: i32, %arg1: memref<8x20xf32, #tpu.memory_space<vmem>>, %arg2: memref<20x4xf32, #tpu.memory_space<vmem>>, %arg3: memref<1x4xf32, #tpu.memory_space<vmem>>, %arg4: memref<1x4xf32, #tpu.memory_space<vmem>>, %arg5: memref<1x1xf32, #tpu.memory_space<smem>>, %arg6: memref<8x1xf32, #tpu.memory_space<vmem>>) attributes {dimension_semantics = [#tpu.dimension_semantics<parallel>], iteration_bounds = array<i64: 1>, scalar_prefetch = 0 : i64, scratch_operands = 0 : i64, tpu.core_type = #tpu.core_type<tc>, window_params = [{transform_indices = @transform_0, window_bounds = array<i64: 8, 20>}, {pipeline_mode = #tpu.pipeline_mode<synchronous>, transform_indices = @transform_1, window_bounds = array<i64: 20, 4>}, {pipeline_mode = #tpu.pipeline_mode<synchronous>, transform_indices = @transform_2, window_bounds = array<i64: 1, 4>}, {pipeline_mode = #tpu.pipeline_mode<synchronous>, transform_indices = @transform_3, window_bounds = array<i64: 1, 4>}, {transform_indices = @transform_4, window_bounds = array<i64: 1, 1>}, {transform_indices = @transform_5, window_bounds = array<i64: 8, 1>}]} {
    %c0 = arith.constant 0 : index
    %c0_0 = arith.constant 0 : index
    %0 = vector.load %arg1[%c0, %c0_0] : memref<8x20xf32, #tpu.memory_space<vmem>>, vector<8x20xf32>
    %c0_1 = arith.constant 0 : index
    %c0_2 = arith.constant 0 : index
    %1 = vector.load %arg2[%c0_1, %c0_2] : memref<20x4xf32, #tpu.memory_space<vmem>>, vector<20x4xf32>
    %cst = arith.constant dense<0.000000e+00> : vector<8x4xf32>
    %2 = tpu.matmul %0, %1, %cst {dimension_numbers = #tpu.dot_dimension_numbers<[1], [0], [0], [1], [0, 0, 1, 1], [], []>} : vector<8x20xf32>, vector<20x4xf32>, vector<8x4xf32> -> vector<8x4xf32>
    %c0_3 = arith.constant 0 : index
    %c0_4 = arith.constant 0 : index
    %3 = vector.load %arg3[%c0_3, %c0_4] : memref<1x4xf32, #tpu.memory_space<vmem>>, vector<1x4xf32>
    %4 = vector.broadcast %3 : vector<1x4xf32> to vector<8x4xf32>
    %5 = arith.addf %2, %4 : vector<8x4xf32>
    %6 = math.tanh %5 : vector<8x4xf32>
    %c0_5 = arith.constant 0 : index
    %c0_6 = arith.constant 0 : index
    %7 = vector.load %arg4[%c0_5, %c0_6] : memref<1x4xf32, #tpu.memory_space<vmem>>, vector<1x4xf32>
    %8 = vector.broadcast %7 : vector<1x4xf32> to vector<8x4xf32>
    %9 = arith.mulf %6, %8 : vector<8x4xf32>
    %cst_7 = arith.constant dense<0.000000e+00> : vector<8xf32>
    %10 = vector.multi_reduction <add>, %9, %cst_7 [1] : vector<8x4xf32> to vector<8xf32>
    %11 = vector.shape_cast %10 : vector<8xf32> to vector<8x1xf32>
    %c0_8 = arith.constant 0 : index
    %c0_9 = arith.constant 0 : index
    %12 = memref.load %arg5[%c0_8, %c0_9] : memref<1x1xf32, #tpu.memory_space<smem>>
    %13 = vector.broadcast %12 : f32 to vector<8x1xf32>
    %14 = arith.addf %11, %13 : vector<8x1xf32>
    %c0_10 = arith.constant 0 : index
    %c0_11 = arith.constant 0 : index
    %15 = vector.load %arg6[%c0_10, %c0_11] : memref<8x1xf32, #tpu.memory_space<vmem>>, vector<8x1xf32>
    tpu.vector_store %arg6[%c0_10, %c0_11], %14 {strides = array<i32>} : memref<8x1xf32, #tpu.memory_space<vmem>>, vector<8x1xf32>,
    return
  }
  func.func @transform_0(%arg0: i32) -> (i32, i32) {
    %c0_i32 = arith.constant 0 : i32
    %c0_i32_0 = arith.constant 0 : i32
    return %arg0, %c0_i32 : i32, i32
  }
  func.func @transform_1(%arg0: i32) -> (i32, i32) {
    %c0_i32 = arith.constant 0 : i32
    %c0_i32_0 = arith.constant 0 : i32
    %c0_i32_1 = arith.constant 0 : i32
    return %c0_i32, %c0_i32_0 : i32, i32
  }
  func.func @transform_2(%arg0: i32) -> (i32, i32) {
    %c0_i32 = arith.constant 0 : i32
    %c0_i32_0 = arith.constant 0 : i32
    %c0_i32_1 = arith.constant 0 : i32
    return %c0_i32, %c0_i32_0 : i32, i32
  }
  func.func @transform_3(%arg0: i32) -> (i32, i32) {
    %c0_i32 = arith.constant 0 : i32
    %c0_i32_0 = arith.constant 0 : i32
    %c0_i32_1 = arith.constant 0 : i32
    return %c0_i32, %c0_i32_0 : i32, i32
  }
  func.func @transform_4(%arg0: i32) -> (i32, i32) {
    %c0_i32 = arith.constant 0 : i32
    %c0_i32_0 = arith.constant 0 : i32
    %c0_i32_1 = arith.constant 0 : i32
    return %c0_i32, %c0_i32_0 : i32, i32
  }
  func.func @transform_5(%arg0: i32) -> (i32, i32) {
    %c0_i32 = arith.constant 0 : i32
    %c0_i32_0 = arith.constant 0 : i32
    return %arg0, %c0_i32 : i32, i32
  }
}

</mosaic_0001>

<bundles_post_ra>
// kernel: tpu_custom_call.1
= control target key start
LH: loop header
LB: loop body
LE: loop exit
PB: predicated region body
PF: predicated region fallthrough
CT: control target
= control target key end

     0   :  { %v157_v0 = vmov 0.0|0.0   ;;  %vm158_vm0 = vmmov 0   ;;  %v159_v3 = vmov 0.0   ;;  %vm36_vm1 = vcmask 1043456   ;;  %s214_s1 = inlined_call_operand.vmem [shape: f32[20,4], index: 1, kind: input, shape index: {}]   ;;  %s215_s0 = inlined_call_operand.vmem [shape: f32[8,20], index: 0, kind: input, shape index: {}]   ;;  %s216_s2 = inlined_call_operand.vmem [shape: f32[1,4], index: 2, kind: input, shape index: {}]   ;;  %s217_s3 = inlined_call_operand.vmem [shape: f32[1,4], index: 3, kind: input, shape index: {}]   ;;  %s218_s4 = inlined_call_operand.<no memory space> [shape: f32[1,1], index: 4, kind: input, shape index: {}]   ;;  %s219_s5 = inlined_call_operand.vmem [shape: f32[8,1], index: 5, kind: output, shape index: {}]  }
   0x1   :  { %149 = vmatprep.subr.bf16.mxu0 %v157_v0  ;;  %v22_v1 = vld [vmem:[%s214_s1] sm:$0xff]  ;;  %v23_v2 = vld [vmem:[%s214_s1 + $0x8] sm:$0xff]  ;;  %146 = vmatprep.mubr.msk.f32.mxu0 %vm158_vm0, %v159_v3  ;;  %v24_v5 = vld [vmem:[%s214_s1 + $0x10] sm:$0xf]  ;;  %vm32_vm2 = vcmask 162816   ;;  %vm119_vm3 = vcmask 31744   ;;  %v124_v15 = vstv %s218_s4 }
   0x2   :  { %v150_v4 = vpack.c.bf16 %v23_v2, %v22_v1  ;;  %v21_v6 = vld [vmem:[%s215_s0] sm:$0xff]  ;;  %vm126_vm4 = vcmask 7168  }
   0x3   :  { %v132_v7 = vld [vmem:[%s216_s2] ss:$0 sm:$0xff] }
   0x4   :  { %151 = vmatpush3.bf16.msra.mxu0 %v150_v4  ;;  %v135_v11 = vld [vmem:[%s217_s3] ss:$0 sm:$0xff] }
   0x5   :  { %144 = vmatprep.subr.mxu0 %v159_v3 }
   0x8   :  { %145 = vmatpush3.msk.msra.mxu0 %vm36_vm1, %v24_v5 }
   0x9   :  { %147 = vmatmul.mubr.msk.f32.vlgmr.msra.gmra.mrb[0].mxu0 %vm32_vm2, %v21_v6 }
  0xdc   :  { %v106_v8 = vpop.f32.mrb[0].mxu0 }
  0xdd   :  { %v107_v9 = vadd.f32 %v132_v7, %v106_v8  ;;  %v148_v10 = vpop.f32.mrb[1].mxu0 }
  0xdf   :  { %155 = vtanh.f32 %v107_v9 }
  0xe9   :  { %v156_v12 = vpop.eup %155 }
  0xea   :  { %v118_v13 = vmul.f32 %v156_v12, %v135_v11 }
  0xec   :  { %v120_v14 = vsel %vm119_vm3, %v118_v13, 0.0 }
  0xed   :  { %121 = vadd.xlane.f32.xlu0 %v120_v14 }
 0x17a   :  { %v122_v16 = vpop.xlane.xlu0 %121 }
 0x17b   :  { %v125_v17 = vadd.f32 %v124_v15, %v122_v16 }
 0x17d   :  { %127 = vst.msk [vmem:[%s219_s5] sm:$0xff] %vm126_vm4, %v125_v17 }

</bundles_post_ra>
